<compile_context>
chip_gen: v7x
topology: tpu7x:2x2x1
jax: 0.10.0
libtpu: 0.0.40
codegen_flags: <defaults>
</compile_context>

<pallas_src>
import math
import functools

import jax
import jax.numpy as jnp
from jax.experimental import pallas as pl
from jax.experimental.pallas import tpu as pltpu


# -----------------------------------------------------------------------------
# Kernel
# -----------------------------------------------------------------------------
def _pma_kernel(x_ref, wkq_ref, wv_ref, wo_ref, bo_ref, q_ref, sel_ref, o_ref,
                *, num_seeds, set_len, dim, num_heads, batch_tile):
    Ns, N, D, H, Bt = num_seeds, set_len, dim, num_heads, batch_tile
    f32, bf16 = jnp.float32, jnp.bfloat16

    x = x_ref[...]                                                  # (Bt*N, D) bf16

    # Attention logits in ONE matmul: Wk and the masked, 1/sqrt(D) pre-scaled
    # seed queries are folded into wkq = Wk @ qh^T in the wrapper, so K is never
    # materialized.  The V projection is a second, lane-aligned matmul.
    scores = jnp.dot(x, wkq_ref[...], preferred_element_type=f32)   # (Bt*N, Ns*H)
    v = jnp.dot(x, wv_ref[...], preferred_element_type=f32)         # (Bt*N, D)

    # Softmax over the set axis (element-wise math stays f32).
    scores3 = scores.reshape(Bt, N, Ns * H)
    m = jnp.max(scores3, axis=1, keepdims=True)
    p = jnp.exp(scores3 - m)
    l = jnp.sum(p, axis=1, keepdims=True)
    attn = p * pl.reciprocal(l, approx=True)                        # (Bt, N, Ns*H)

    # A @ V without head-split reshapes: one constant 0/1 head-broadcast matmul
    # replicates each (seed, head) weight across its D/H lanes, then an
    # element-wise multiply with V and a sublane reduction over the set axis.
    w = jnp.dot(attn.reshape(Bt * N, Ns * H).astype(bf16), sel_ref[...],
                preferred_element_type=f32)                         # (Bt*N, Ns*D)
    if Ns == 1:
        attn_out = jnp.sum((w * v).reshape(Bt, N, D), axis=1)       # (Bt, D)
        outs_flat = q_ref[...] + attn_out                           # (Bt*Ns, D)
    else:
        w4 = w.reshape(Bt, N, Ns, D)
        attn_out = jnp.sum(w4 * v.reshape(Bt, N, 1, D), axis=1)     # (Bt, Ns, D)
        outs_flat = (q_ref[...][None, :, :] + attn_out).reshape(Bt * Ns, D)

    # Residual 2: outs + relu(fc_o(outs)).
    ff = jnp.dot(outs_flat.astype(bf16), wo_ref[...],
                 preferred_element_type=f32) + bo_ref[...]
    o_ref[...] = outs_flat + jnp.maximum(ff, 0.0)                   # (Bt*Ns, D) f32


# -----------------------------------------------------------------------------
# Generation-aware tiling helpers
# -----------------------------------------------------------------------------
def _tpu_generation_info():
    """Best-effort (TensorCores addressable via dimension_semantics, VMEM bytes)."""
    kind = ""
    try:
        kind = jax.devices()[0].device_kind.lower()
    except Exception:
        pass
    if "v7" in kind:
        n_tc, vmem = 2, 64 * 1024 * 1024
    elif "v4" in kind or "v5p" in kind:
        n_tc, vmem = 2, 128 * 1024 * 1024          # megacore: 2 TCs share the grid
    elif "v5" in kind or "v6" in kind or "lite" in kind:
        n_tc, vmem = 1, 128 * 1024 * 1024          # v5e / v6e: single TensorCore
    else:
        n_tc, vmem = 1, 64 * 1024 * 1024           # unknown: conservative VMEM
    try:  # refine VMEM capacity from the runtime when the query is available
        cap = int(getattr(pltpu.get_tpu_info(), "vmem_capacity_bytes", 0))
        if 16 * 1024 * 1024 <= cap <= 256 * 1024 * 1024:
            vmem = cap
    except Exception:
        pass
    return n_tc, vmem


def _bytes_per_batch_element(N, D, Ns, H):
    """Rough per-batch-element VMEM footprint of one grid step, counting the
    double-buffered bf16 X block AND the dominant f32 intermediates."""
    f32 = 4
    x_blk = 2 * (N * D * 2)                  # bf16 X block, double-buffered
    scores = 3 * N * Ns * H * f32            # scores / exp / attn
    vproj = N * D * f32                      # V projection
    av = 2 * N * Ns * D * f32                # head-broadcast matmul out + product
    out_blk = 2 * Ns * D * f32               # f32 output block, double-buffered
    return x_blk + scores + vproj + av + out_blk


def _choose_batch_tile(B, N, D, Ns, H, n_tc, vmem_limit):
    budget = vmem_limit // 2                 # headroom for weights / compiler scratch
    cap = max(1, budget // _bytes_per_batch_element(N, D, Ns, H))
    if n_tc > 1 and B >= 2:
        bt = -(-B // n_tc)                   # one grid step per TensorCore
    else:
        bt = B                               # single grid step on 1-TC chips
    return max(1, min(bt, cap))


# -----------------------------------------------------------------------------
# Wrapper
# -----------------------------------------------------------------------------
def pma_forward(X, S, Wq, Wk, Wv, Wo, bo, *, num_heads, batch_tile=None):
    """X: (B, N, D) f32; S: (1, Ns, D) f32; W*: (D, D) stored so y = x @ W;
    bo: (D,).  Returns jnp.squeeze of the (B, Ns, D) PMA output (mirrors the
    PyTorch module's `.squeeze()`, which also drops the batch dim when B == 1)."""
    B, N, D = X.shape
    Ns = S.shape[1]
    H = num_heads
    assert D % H == 0
    dh = D // H
    f32, bf16 = jnp.float32, jnp.bfloat16

    # ---- grid-invariant constants, hoisted out of the per-step body ----------
    # NOTE: the reference divides by sqrt(query.shape[-1]) == sqrt(dim), not
    # sqrt(head_dim).  This is intentional -- do not "fix".
    q = jnp.dot(S[0].astype(f32), Wq.astype(f32))                    # (Ns, D) f32
    scale = 1.0 / math.sqrt(D)
    head_of_col = jnp.arange(D) // dh                                # (D,)
    head_of_row = jnp.arange(Ns * H) % H                             # (Ns*H,)
    seed_of_row = jnp.arange(Ns * H) // H
    qh = jnp.where(head_of_col[None, :] == head_of_row[:, None],
                   q[seed_of_row] * scale, 0.0)                      # (Ns*H, D)
    wkq = jnp.dot(Wk.astype(f32), qh.T).astype(bf16)                 # (D, Ns*H)

    # Constant 0/1 head-broadcast matrix for A@V:
    #   sel[s*H + h, s*D + d] = 1  iff  d // (D/H) == h.
    col = jnp.arange(Ns * D)
    sel = ((col[None, :] // D == seed_of_row[:, None]) &
           ((col[None, :] % D) // dh == head_of_row[:, None])).astype(bf16)

    Wv_b, Wo_b = Wv.astype(bf16), Wo.astype(bf16)
    bo2 = bo.reshape(1, D).astype(f32)

    # ---- generation-aware batch tiling & VMEM budget --------------------------
    n_tc, vmem_bytes = _tpu_generation_info()
    vmem_limit = int(min(0.75 * vmem_bytes, 100 * 1024 * 1024))
    if batch_tile is not None:
        Bt = max(1, int(batch_tile))
    else:
        Bt = _choose_batch_tile(B, N, D, Ns, H, n_tc, vmem_limit)
    num_steps = -(-B // Bt)
    B_pad = num_steps * Bt

    # X as dense (Bt*N, D) slabs: contiguous DMA, sublane-dense VMEM, no
    # in-kernel reshape across the batch-tile axis.  Zero-padded batch rows give
    # a uniform softmax (finite values, no NaN) and are sliced off below.
    X_b = X.astype(bf16)
    if B_pad != B:
        X_b = jnp.pad(X_b, ((0, B_pad - B), (0, 0), (0, 0)))
    X3 = X_b.reshape(num_steps, Bt * N, D)

    kernel = functools.partial(
        _pma_kernel, num_seeds=Ns, set_len=N, dim=D,
        num_heads=H, batch_tile=Bt)

    # Grid-invariant inputs: drop their (useless) double-buffering once the
    # weights are big enough to matter against the VMEM budget.
    pipe = {"pipeline_mode": pl.Buffered(1)} if D >= 256 else {}

    def inv_spec(shape):
        return pl.BlockSpec(shape, lambda b: (0,) * len(shape), **pipe)

    out3 = pl.pallas_call(
        kernel,
        out_shape=jax.ShapeDtypeStruct((num_steps, Bt * Ns, D), f32),
        grid_spec=pltpu.PrefetchScalarGridSpec(
            num_scalar_prefetch=0,
            grid=(num_steps,),
            in_specs=[
                pl.BlockSpec((None, Bt * N, D), lambda b: (b, 0, 0)),  # X slab
                inv_spec((D, Ns * H)),                                 # wkq (Wk @ qh^T)
                inv_spec((D, D)),                                      # Wv
                inv_spec((D, D)),                                      # Wo
                inv_spec((1, D)),                                      # bo
                inv_spec((Ns, D)),                                     # q (f32, residual)
                inv_spec((Ns * H, Ns * D)),                            # head-broadcast sel
            ],
            out_specs=pl.BlockSpec((None, Bt * Ns, D), lambda b: (b, 0, 0)),
        ),
        compiler_params=pltpu.CompilerParams(
            dimension_semantics=("parallel",),
            vmem_limit_bytes=vmem_limit,
        ),
    )(X3, wkq, Wv_b, Wo_b, bo2, q, sel)

    out = out3.reshape(B_pad, Ns, D)[:B]
    # `.squeeze()` drops ALL unit dims (incl. batch when B == 1), mirroring the
    # PyTorch module -- intentionally shape-fragile.
    return jnp.squeeze(out)


# -----------------------------------------------------------------------------
# Pure-JAX reference (mirrors the PyTorch module, f32 throughout)
# -----------------------------------------------------------------------------
def pma_reference(X, S, Wq, Wk, Wv, Wo, bo, *, num_heads):
    B, N, D = X.shape
    Ns = S.shape[1]
    dh = D // num_heads
    q = jnp.einsum('bsd,de->bse', jnp.broadcast_to(S, (B, Ns, D)), Wq)
    k = jnp.einsum('bnd,de->bne', X, Wk)
    v = jnp.einsum('bnd,de->bne', X, Wv)
    q3 = q.reshape(B, Ns, num_heads, dh)
    k3 = k.reshape(B, N, num_heads, dh)
    v3 = v.reshape(B, N, num_heads, dh)
    logits = jnp.einsum('bqhd,bkhd->bhqk', q3, k3) / math.sqrt(D)
    attn = jax.nn.softmax(logits, axis=-1)
    out = jnp.einsum('bhqk,bkhd->bqhd', attn, v3).reshape(B, Ns, D)
    outs = q + out
    ff = jnp.einsum('bqd,de->bqe', outs, Wo) + bo
    outs = outs + jax.nn.relu(ff)
    return jnp.squeeze(outs)


if __name__ == "__main__":
    # Small shapes consistent with PMA(dim, num_heads, num_seeds).
    B, N, D = 2, 8, 32
    NUM_HEADS, NUM_SEEDS = 4, 1

    key = jax.random.PRNGKey(0)
    ks = jax.random.split(key, 7)

    # Deterministic parameter init (synthetic weights, not a checkpoint).
    xavier = math.sqrt(6.0 / (NUM_SEEDS + D))
    S = jax.random.uniform(ks[0], (1, NUM_SEEDS, D), jnp.float32, -xavier, xavier)
    wb = 1.0 / math.sqrt(D)
    Wq = jax.random.uniform(ks[1], (D, D), jnp.float32, -wb, wb)
    Wk = jax.random.uniform(ks[2], (D, D), jnp.float32, -wb, wb)
    Wv = jax.random.uniform(ks[3], (D, D), jnp.float32, -wb, wb)
    Wo = jax.random.uniform(ks[4], (D, D), jnp.float32, -wb, wb)
    bo = jax.random.uniform(ks[5], (D,), jnp.float32, -wb, wb)

    X = jax.random.normal(ks[6], (B, N, D), jnp.float32)

    out = pma_forward(X, S, Wq, Wk, Wv, Wo, bo, num_heads=NUM_HEADS)
    out = jax.block_until_ready(out)

    ref = pma_reference(X, S, Wq, Wk, Wv, Wo, bo, num_heads=NUM_HEADS)
    assert out.shape == ref.shape, (out.shape, ref.shape)
    # bf16 MXU operands (f32 accumulation) -> slightly looser tolerance than pure f32.
    assert jnp.allclose(out, ref, rtol=3e-2, atol=3e-2), "mismatch vs reference"

    print("KERNEL_OK")
</pallas_src>

<mosaic_0001>
module attributes {stable_mosaic.version = 11 : i64} {
  func.func @_pma_kernel(%arg0: i32, %arg1: memref<1x16x32xbf16, #tpu.memory_space<vmem>>, %arg2: memref<32x4xbf16, #tpu.memory_space<vmem>>, %arg3: memref<32x32xbf16, #tpu.memory_space<vmem>>, %arg4: memref<32x32xbf16, #tpu.memory_space<vmem>>, %arg5: memref<1x32xf32, #tpu.memory_space<vmem>>, %arg6: memref<1x32xf32, #tpu.memory_space<vmem>>, %arg7: memref<4x32xbf16, #tpu.memory_space<vmem>>, %arg8: memref<1x2x32xf32, #tpu.memory_space<vmem>>) attributes {dimension_semantics = [#tpu.dimension_semantics<parallel>], iteration_bounds = array<i64: 1>, scalar_prefetch = 0 : i64, scratch_operands = 0 : i64, tpu.core_type = #tpu.core_type<tc>, window_params = [{transform_indices = @transform_0, window_bounds = array<i64: 1, 16, 32>}, {pipeline_mode = #tpu.pipeline_mode<synchronous>, transform_indices = @transform_1, window_bounds = array<i64: 32, 4>}, {pipeline_mode = #tpu.pipeline_mode<synchronous>, transform_indices = @transform_2, window_bounds = array<i64: 32, 32>}, {pipeline_mode = #tpu.pipeline_mode<synchronous>, transform_indices = @transform_3, window_bounds = array<i64: 32, 32>}, {pipeline_mode = #tpu.pipeline_mode<synchronous>, transform_indices = @transform_4, window_bounds = array<i64: 1, 32>}, {pipeline_mode = #tpu.pipeline_mode<synchronous>, transform_indices = @transform_5, window_bounds = array<i64: 1, 32>}, {pipeline_mode = #tpu.pipeline_mode<synchronous>, transform_indices = @transform_6, window_bounds = array<i64: 4, 32>}, {transform_indices = @transform_7, window_bounds = array<i64: 1, 2, 32>}]} {
    %c0 = arith.constant 0 : index
    %c0_0 = arith.constant 0 : index
    %c0_1 = arith.constant 0 : index
    %0 = vector.load %arg1[%c0, %c0_0, %c0_1] : memref<1x16x32xbf16, #tpu.memory_space<vmem>>, vector<1x16x32xbf16>
    %1 = vector.shape_cast %0 : vector<1x16x32xbf16> to vector<16x32xbf16>
    %c0_2 = arith.constant 0 : index
    %c0_3 = arith.constant 0 : index
    %2 = vector.load %arg2[%c0_2, %c0_3] : memref<32x4xbf16, #tpu.memory_space<vmem>>, vector<32x4xbf16>
    %cst = arith.constant dense<0.000000e+00> : vector<16x4xf32>
    %3 = tpu.matmul %1, %2, %cst {dimension_numbers = #tpu.dot_dimension_numbers<[1], [0], [0], [1], [0, 0, 1, 1], [], []>} : vector<16x32xbf16>, vector<32x4xbf16>, vector<16x4xf32> -> vector<16x4xf32>
    %c0_4 = arith.constant 0 : index
    %c0_5 = arith.constant 0 : index
    %4 = vector.load %arg3[%c0_4, %c0_5] : memref<32x32xbf16, #tpu.memory_space<vmem>>, vector<32x32xbf16>
    %cst_6 = arith.constant dense<0.000000e+00> : vector<16x32xf32>
    %5 = tpu.matmul %1, %4, %cst_6 {dimension_numbers = #tpu.dot_dimension_numbers<[1], [0], [0], [1], [0, 0, 1, 1], [], []>} : vector<16x32xbf16>, vector<32x32xbf16>, vector<16x32xf32> -> vector<16x32xf32>
    %6 = vector.shape_cast %3 : vector<16x4xf32> to vector<2x8x4xf32>
    %cst_7 = arith.constant dense<0xFF800000> : vector<2x4xf32>
    %7 = vector.multi_reduction <maximumf>, %6, %cst_7 [1] : vector<2x8x4xf32> to vector<2x4xf32>
    %8 = vector.shape_cast %7 : vector<2x4xf32> to vector<2x1x4xf32>
    %9 = vector.broadcast %8 : vector<2x1x4xf32> to vector<2x8x4xf32>
    %10 = arith.subf %6, %9 : vector<2x8x4xf32>
    %11 = math.exp %10 : vector<2x8x4xf32>
    %cst_8 = arith.constant dense<0.000000e+00> : vector<2x4xf32>
    %12 = vector.multi_reduction <add>, %11, %cst_8 [1] : vector<2x8x4xf32> to vector<2x4xf32>
    %13 = vector.shape_cast %12 : vector<2x4xf32> to vector<2x1x4xf32>
    %14 = tpu.reciprocal %13 {approx = true} : vector<2x1x4xf32> -> vector<2x1x4xf32>
    %15 = vector.broadcast %14 : vector<2x1x4xf32> to vector<2x8x4xf32>
    %16 = arith.mulf %11, %15 : vector<2x8x4xf32>
    %17 = vector.shape_cast %16 : vector<2x8x4xf32> to vector<16x4xf32>
    %18 = arith.truncf %17 : vector<16x4xf32> to vector<16x4xbf16>
    %c0_9 = arith.constant 0 : index
    %c0_10 = arith.constant 0 : index
    %19 = vector.load %arg7[%c0_9, %c0_10] : memref<4x32xbf16, #tpu.memory_space<vmem>>, vector<4x32xbf16>
    %cst_11 = arith.constant dense<0.000000e+00> : vector<16x32xf32>
    %20 = tpu.matmul %18, %19, %cst_11 {dimension_numbers = #tpu.dot_dimension_numbers<[1], [0], [0], [1], [0, 0, 1, 1], [], []>} : vector<16x4xbf16>, vector<4x32xbf16>, vector<16x32xf32> -> vector<16x32xf32>
    %21 = arith.mulf %20, %5 : vector<16x32xf32>
    %22 = vector.shape_cast %21 : vector<16x32xf32> to vector<2x8x32xf32>
    %cst_12 = arith.constant dense<0.000000e+00> : vector<2x32xf32>
    %23 = vector.multi_reduction <add>, %22, %cst_12 [1] : vector<2x8x32xf32> to vector<2x32xf32>
    %c0_13 = arith.constant 0 : index
    %c0_14 = arith.constant 0 : index
    %24 = vector.load %arg6[%c0_13, %c0_14] : memref<1x32xf32, #tpu.memory_space<vmem>>, vector<1x32xf32>
    %25 = vector.broadcast %24 : vector<1x32xf32> to vector<2x32xf32>
    %26 = arith.addf %25, %23 : vector<2x32xf32>
    %27 = arith.truncf %26 : vector<2x32xf32> to vector<2x32xbf16>
    %c0_15 = arith.constant 0 : index
    %c0_16 = arith.constant 0 : index
    %28 = vector.load %arg4[%c0_15, %c0_16] : memref<32x32xbf16, #tpu.memory_space<vmem>>, vector<32x32xbf16>
    %cst_17 = arith.constant dense<0.000000e+00> : vector<2x32xf32>
    %29 = tpu.matmul %27, %28, %cst_17 {dimension_numbers = #tpu.dot_dimension_numbers<[1], [0], [0], [1], [0, 0, 1, 1], [], []>} : vector<2x32xbf16>, vector<32x32xbf16>, vector<2x32xf32> -> vector<2x32xf32>
    %c0_18 = arith.constant 0 : index
    %c0_19 = arith.constant 0 : index
    %30 = vector.load %arg5[%c0_18, %c0_19] : memref<1x32xf32, #tpu.memory_space<vmem>>, vector<1x32xf32>
    %31 = vector.broadcast %30 : vector<1x32xf32> to vector<2x32xf32>
    %32 = arith.addf %29, %31 : vector<2x32xf32>
    %cst_20 = arith.constant 0.000000e+00 : f32
    %33 = vector.broadcast %cst_20 : f32 to vector<2x32xf32>
    %34 = arith.maximumf %32, %33 : vector<2x32xf32>
    %35 = arith.addf %26, %34 : vector<2x32xf32>
    %c0_21 = arith.constant 0 : index
    %c0_22 = arith.constant 0 : index
    %c0_23 = arith.constant 0 : index
    %36 = vector.load %arg8[%c0_21, %c0_22, %c0_23] : memref<1x2x32xf32, #tpu.memory_space<vmem>>, vector<1x2x32xf32>
    %37 = vector.shape_cast %36 : vector<1x2x32xf32> to vector<2x32xf32>
    %38 = vector.shape_cast %35 : vector<2x32xf32> to vector<1x2x32xf32>
    tpu.vector_store %arg8[%c0_21, %c0_22, %c0_23], %38 {strides = array<i32>} : memref<1x2x32xf32, #tpu.memory_space<vmem>>, vector<1x2x32xf32>,
    return
  }
  func.func @transform_0(%arg0: i32) -> (i32, i32, i32) {
    %c0_i32 = arith.constant 0 : i32
    %c0_i32_0 = arith.constant 0 : i32
    %c0_i32_1 = arith.constant 0 : i32
    return %arg0, %c0_i32, %c0_i32_0 : i32, i32, i32
  }
  func.func @transform_1(%arg0: i32) -> (i32, i32) {
    %c0_i32 = arith.constant 0 : i32
    %c0_i32_0 = arith.constant 0 : i32
    %c0_i32_1 = arith.constant 0 : i32
    return %c0_i32, %c0_i32_0 : i32, i32
  }
  func.func @transform_2(%arg0: i32) -> (i32, i32) {
    %c0_i32 = arith.constant 0 : i32
    %c0_i32_0 = arith.constant 0 : i32
    %c0_i32_1 = arith.constant 0 : i32
    return %c0_i32, %c0_i32_0 : i32, i32
  }
  func.func @transform_3(%arg0: i32) -> (i32, i32) {
    %c0_i32 = arith.constant 0 : i32
    %c0_i32_0 = arith.constant 0 : i32
    %c0_i32_1 = arith.constant 0 : i32
    return %c0_i32, %c0_i32_0 : i32, i32
  }
  func.func @transform_4(%arg0: i32) -> (i32, i32) {
    %c0_i32 = arith.constant 0 : i32
    %c0_i32_0 = arith.constant 0 : i32
    %c0_i32_1 = arith.constant 0 : i32
    return %c0_i32, %c0_i32_0 : i32, i32
  }
  func.func @transform_5(%arg0: i32) -> (i32, i32) {
    %c0_i32 = arith.constant 0 : i32
    %c0_i32_0 = arith.constant 0 : i32
    %c0_i32_1 = arith.constant 0 : i32
    return %c0_i32, %c0_i32_0 : i32, i32
  }
  func.func @transform_6(%arg0: i32) -> (i32, i32) {
    %c0_i32 = arith.constant 0 : i32
    %c0_i32_0 = arith.constant 0 : i32
    %c0_i32_1 = arith.constant 0 : i32
    return %c0_i32, %c0_i32_0 : i32, i32
  }
  func.func @transform_7(%arg0: i32) -> (i32, i32, i32) {
    %c0_i32 = arith.constant 0 : i32
    %c0_i32_0 = arith.constant 0 : i32
    %c0_i32_1 = arith.constant 0 : i32
    return %arg0, %c0_i32, %c0_i32_0 : i32, i32, i32
  }
}

</mosaic_0001>

<bundles_post_ra>
// kernel: tpu_custom_call.1
= control target key start
LH: loop header
LB: loop body
LE: loop exit
PB: predicated region body
PF: predicated region fallthrough
CT: control target
= control target key end

     0   :  { %12 = vsyncpa [#allocation3], 0  ;;  %s613_s0 = inlined_call_operand.vmem [shape: bf16[1,16,32], index: 0, kind: input, shape index: {}]   ;;  %s614_s1 = inlined_call_operand.vmem [shape: bf16[32,4], index: 1, kind: input, shape index: {}]   ;;  %s615_s2 = inlined_call_operand.vmem [shape: bf16[32,32], index: 2, kind: input, shape index: {}]   ;;  %s616_s3 = inlined_call_operand.hbm [shape: bf16[32,32], index: 3, kind: input, shape index: {}]   ;;  %s617_s4 = inlined_call_operand.vmem [shape: f32[1,32], index: 4, kind: input, shape index: {}]   ;;  %s618_s5 = inlined_call_operand.vmem [shape: f32[1,32], index: 5, kind: input, shape index: {}]   ;;  %s619_s6 = inlined_call_operand.vmem [shape: bf16[4,32], index: 6, kind: input, shape index: {}]   ;;  %s620_s7 = inlined_call_operand.hbm [shape: f32[1,2,32], index: 7, kind: output, shape index: {}]  }
   0x1   :  { %13 = vsyncpa [#allocation4], 0  ;;  %s494_s24 = smov [#allocation2]   ;;  %s446_s28 = scalar_lea.hbm %s616_s3, 256 }
   0x2   :  { %s25_s25 = sshll.u32 %s494_s24, 4  ;;  %p447_p0 = scmp.ne.s32.totalorder %s616_s3, %s446_s28  ;;  %s26_s25 = int_to_ptr.vmem [resolvable:$true] %s25_s25 }
   0x3   :  { %p450_p1 = scmp.lt.u32.totalorder %s446_s28, %s616_s3 }
   0x5   :  { %p452_p2 = pnand %p450_p1, %p447_p0 }
   0x7   :  { %455 = shalt.err (!%p452_p2)
}
   0x8   :  { %s456_s10 = scalar_lea.vmem %s26_s25, 256  ;;  %p461_p4 = scmp.lt.s32.totalorder %s26_s25, %s26_s25 }
   0x9   :  { %p457_p3 = scmp.ne.s32.totalorder %s26_s25, %s456_s10  ;;  %p462_p5 = scmp.lt.s32.totalorder %s456_s10, %s456_s10 }
   0xb   :  { %p463_p6 = por %p462_p5, %p461_p4 }
   0xd   :  { %p464_p7 = pnand %p463_p6, %p457_p3 }
   0xf   :  { %467 = shalt.err (!%p464_p7)
}
  0x10   :  { %s495_s11 = smov 64   ;;  %s496_s12 = smov 4  }
  0x11   :  { %31 = dma.hbm_to_vmem [thread:$0]  %s616_s3, 256, %s26_s25, [#allocation3], %s495_s11, %s495_s11, %s496_s12  }
  0x12   :  { %490 = dma.done.wait [#allocation3], 256  }
  0x13   :  { %491 = vsyncadd [#allocation3], 4294967040  ;;  %v497_v0 = vmov 0.0   ;;  %vm498_vm0 = vmmov 0   ;;  %v431_v1 = vld [vmem:[%s614_s1] sm:$0xff]   ;;  %v432_v2 = vld [vmem:[%s614_s1 + $0x8] sm:$0xff]  }
  0x14   :  { %395 = vmatprep.subr.bf16.mxu0 %v497_v0  ;;  %399 = vmatprep.mubr.msk.bf16.mxu0 %vm498_vm0, %v497_v0  ;;  %v433_v3 = vld [vmem:[%s613_s0] sm:$0xff]   ;;  %vm65_vm1 = vcmask 261120   ;;  %v435_v5 = vld [vmem:[%s615_s2 + $0x8] sm:$0xff]   ;;  %vm211_vm2 = vcmask 1041408   ;;  %vm167_vm3 = vcmask 31744   ;;  %vm281_vm4 = vcmask 1041409  }
  0x15   :  { %403 = vmatprep.subr.bf16.mxu1 %v497_v0  ;;  %407 = vmatprep.mubr.msk.bf16.mxu1 %vm498_vm0, %v497_v0  ;;  %v434_v4 = vld [vmem:[%s615_s2] sm:$0xff]   ;;  %v437_v56 = vld [vmem:[#allocation2 + $0x8] sm:$0xff]   ;;  %s499_s26 = smov [#allocation5]   ;;  %vm354_vm5 = vcmask 254976  }
  0x16   :  { %396 = vmatpush3.bf16.msra.mxu0 %v431_v1  ;;  %404 = vmatpush3.bf16.msra.mxu1 %v434_v4  ;;  %v207_v6 = vld [vmem:[%s619_s6] sm:$0x3]  ;;  %s362_s27 = sshll.u32 %s499_s26, 4  ;;  %s363_s27 = int_to_ptr.vmem [resolvable:$true] %s362_s27 }
  0x17   :  { %397 = vmatprep.subr.bf16.mxu0 %v497_v0  ;;  %405 = vmatprep.subr.bf16.mxu1 %v497_v0  ;;  %v213_v7 = vsel %vm211_vm2, %v207_v6, 0  ;;  %v436_v55 = vld [vmem:[#allocation2] sm:$0xff]   ;;  %p473_p9 = scmp.lt.s32.totalorder %s363_s27, %s363_s27 }
  0x1a   :  { %398 = vmatpush3.bf16.msra.mxu0 %v432_v2  ;;  %406 = vmatpush3.bf16.msra.mxu1 %v435_v5 }
  0x1b   :  { %411 = vmatprep.subr.bf16.mxu0 %v497_v0  ;;  %417 = vmatprep.subr.bf16.mxu1 %v497_v0 }
  0x1d   :  { %400 = vmatmul.mubr.msk.bf16.vlgmr.msra.gmra.mrb[0].mxu0 %vm65_vm1, %v433_v3  ;;  %408 = vmatmul.mubr.msk.bf16.vlgmr.msra.gmra.mrb[0].mxu1 %vm65_vm1, %v433_v3 }
  0x1e   :  { %413 = vmatprep.mubr.msk.bf16.mxu0 %vm498_vm0, %v497_v0  ;;  %412 = vmatpush3.bf16.msra.mxu0 %v213_v7 }
  0x1f   :  { %421 = vmatprep.mubr.msk.bf16.mxu1 %vm498_vm0, %v497_v0  ;;  %418 = vmatpush3.bf16.msra.mxu1 %v436_v55 }
  0x20   :  { %419 = vmatprep.subr.bf16.mxu1 %v497_v0 }
  0x23   :  { %420 = vmatpush3.bf16.msra.mxu1 %v437_v56 }
  0xf0   :  { %v103_v8 = vpop.f32.mrb[0].mxu0  ;;  %v160_v51 = vpop.f32.mrb[0].mxu1 }
  0xf1   :  { %v168_v9 = vsel %vm167_vm3, %v103_v8, -inf  ;;  %v401_v10 = vpop.f32.mrb[1].mxu0  ;;  %v409_v52 = vpop.f32.mrb[1].mxu1 }
  0xf2   :  { %v169_v11 = vrot.slane %v168_v9, 4  ;;  %v106_v12 = vpop.f32.mrb[2].mxu0  ;;  %v163_v53 = vpop.f32.mrb[2].mxu1 }
  0xf3   :  { %v175_v13 = vsel %vm167_vm3, %v106_v12, -inf  ;;  %v402_v14 = vpop.f32.mrb[3].mxu0  ;;  %v410_v54 = vpop.f32.mrb[3].mxu1 }
  0xf4   :  { %v170_v15 = vmax.f32 %v168_v9, %v169_v11  ;;  %v176_v16 = vrot.slane %v175_v13, 4 }
  0xf6   :  { %v171_v17 = vrot.slane %v170_v15, 2  ;;  %v177_v18 = vmax.f32 %v175_v13, %v176_v16  ;;  %v379_v13 = vld [vmem:[%s618_s5] ss:$0 sm:$0xff]  ;;  %s468_s5 = scalar_lea.vmem %s363_s27, 32 }
  0xf7   :  { %p469_p8 = scmp.ne.s32.totalorder %s363_s27, %s468_s5  ;;  %p474_p10 = scmp.lt.s32.totalorder %s468_s5, %s468_s5 }
  0xf8   :  { %v172_v19 = vmax.f32 %v170_v15, %v171_v17  ;;  %v178_v20 = vrot.slane %v177_v18, 2  ;;  %v380_v17 = vld [vmem:[%s617_s4] ss:$0 sm:$0xff] }
  0xf9   :  { %p475_p11 = por %p474_p10, %p473_p9 }
  0xfa   :  { %v173_v21 = vrot.slane %v172_v19, 1  ;;  %v179_v22 = vmax.f32 %v177_v18, %v178_v20 }
  0xfb   :  { %p476_p12 = pnand %p475_p11, %p469_p8 }
  0xfc   :  { %v174_v23 = vmax.f32 %v172_v19, %v173_v21  ;;  %v180_v24 = vrot.slane %v179_v22, 1 }
  0xfe   :  { %v182_v25 = vsub.f32 %v103_v8, %v174_v23  ;;  %v181_v26 = vmax.f32 %v179_v22, %v180_v24 }
 0x100   :  { %v184_v27 = vmul.f32 1.442695, %v182_v25  ;;  %v183_v28 = vsub.f32 %v106_v12, %v181_v26 }
 0x102   :  { %438 = vpow2.f32 %v184_v27  ;;  %v186_v29 = vmul.f32 1.442695, %v183_v28 }
 0x104   :  { %440 = vpow2.f32 %v186_v29 }
 0x10c   :  { %v439_v30 = vpop.eup %438 }
 0x10d   :  { %v188_v31 = vsel %vm167_vm3, %v439_v30, 0.0 }
 0x10e   :  { %v441_v32 = vpop.eup %440  ;;  %v189_v33 = vrot.slane %v188_v31, 4 }
 0x10f   :  { %v195_v34 = vsel %vm167_vm3, %v441_v32, 0.0 }
 0x110   :  { %v190_v35 = vadd.f32 %v189_v33, %v188_v31  ;;  %v196_v36 = vrot.slane %v195_v34, 4 }
 0x112   :  { %v191_v37 = vrot.slane %v190_v35, 2  ;;  %v197_v38 = vadd.f32 %v196_v36, %v195_v34 }
 0x114   :  { %v192_v39 = vadd.f32 %v191_v37, %v190_v35  ;;  %v198_v40 = vrot.slane %v197_v38, 2 }
 0x116   :  { %v193_v41 = vrot.slane %v192_v39, 1  ;;  %v199_v42 = vadd.f32 %v198_v40, %v197_v38 }
 0x118   :  { %v194_v43 = vadd.f32 %v193_v41, %v192_v39  ;;  %v200_v44 = vrot.slane %v199_v42, 1 }
 0x11a   :  { %442 = vrcp.f32 %v194_v43  ;;  %v201_v45 = vadd.f32 %v200_v44, %v199_v42 }
 0x11c   :  { %444 = vrcp.f32 %v201_v45 }
 0x124   :  { %v443_v46 = vpop.eup %442 }
 0x125   :  { %v204_v48 = vmul.f32 %v443_v46, %v439_v30 }
 0x126   :  { %v445_v47 = vpop.eup %444 }
 0x127   :  { %v205_v49 = vmul.f32 %v445_v47, %v441_v32 }
 0x129   :  { %v206_v50 = vpack.c.bf16 %v205_v49, %v204_v48 }
 0x12b   :  { %414 = vmatmul.mubr.msk.bf16.vlgmr.msra.gmra.mrb[4].mxu0 %vm167_vm3, %v206_v50 }
 0x1fe   :  { %v249_v57 = vpop.f32.mrb[4].mxu0 }
 0x1ff   :  { %v256_v58 = vmul.f32 %v249_v57, %v160_v51  ;;  %v415_v59 = vpop.f32.mrb[5].mxu0 }
 0x200   :  { %v252_v60 = vpop.f32.mrb[6].mxu0 }
 0x201   :  { %v258_v61 = vsel %vm65_vm1, %v256_v58, 0.0  ;;  %v257_v62 = vmul.f32 %v252_v60, %v163_v53  ;;  %v416_v63 = vpop.f32.mrb[7].mxu0 }
 0x202   :  { %v259_v1 = vrot.slane %v258_v61, 4 }
 0x203   :  { %v265_v2 = vsel %vm65_vm1, %v257_v62, 0.0 }
 0x204   :  { %v260_v3 = vadd.f32 %v259_v1, %v258_v61  ;;  %v266_v4 = vrot.slane %v265_v2, 4 }
 0x206   :  { %v261_v5 = vrot.slane %v260_v3, 2  ;;  %v267_v6 = vadd.f32 %v266_v4, %v265_v2 }
 0x208   :  { %v262_v7 = vadd.f32 %v261_v5, %v260_v3  ;;  %v268_v8 = vrot.slane %v267_v6, 2 }
 0x20a   :  { %v263_v0 = vrot.slane %v262_v7, 1  ;;  %v269_v9 = vadd.f32 %v268_v8, %v267_v6 }
 0x20c   :  { %v270_v10 = vrot.slane %v269_v9, 1  ;;  %v264_v11 = vadd.f32 %v263_v0, %v262_v7 }
 0x20e   :  { %v271_v12 = vadd.f32 %v270_v10, %v269_v9 }
 0x210   :  { %v282_v14 = vsel %vm281_vm4, %v271_v12, %v264_v11 }
 0x211   :  { %v284_v15 = vadd.f32 %v379_v13, %v282_v14 }
 0x213   :  { %v285_v16 = vpack.c.bf16 %v284_v15, %v284_v15 }
 0x215   :  { %422 = vmatmul.mubr.msk.bf16.vlgmr.msra.gmra.mrb[4].mxu1 %vm65_vm1, %v285_v16 }
 0x2e8   :  { %v346_v18 = vpop.f32.mrb[4].mxu1 }
 0x2e9   :  { %v347_v19 = vadd.f32 %v380_v17, %v346_v18  ;;  %v423_v20 = vpop.f32.mrb[5].mxu1 }
 0x2ea   :  { %v349_v21 = vpop.f32.mrb[6].mxu1 }
 0x2eb   :  { %v352_v22 = vmax.f32 %v347_v19, 0.0  ;;  %v424_v23 = vpop.f32.mrb[7].mxu1 }
 0x2ed   :  { %v353_v24 = vadd.f32 %v352_v22, %v284_v15 }
 0x2ef   :  { %355 = vst.msk [vmem:[#allocation5] sm:$0x3] %vm354_vm5, %v353_v24 }
 0x2f0   :  { %479 = shalt.err (!%p476_p12)
}
 0x2f1   :  { %s480_s29 = scalar_lea.hbm %s620_s7, 32 }
 0x2f2   :  { %p481_p13 = scmp.ne.s32.totalorder %s620_s7, %s480_s29  ;;  %p484_p0 = scmp.lt.u32.totalorder %s480_s29, %s620_s7 }
 0x2f4   :  { %p486_p1 = pnand %p484_p0, %p481_p13 }
 0x2f6   :  { %489 = shalt.err (!%p486_p1)
}
 0x2f7   :  { %365 = dma.vmem_to_hbm [thread:$0]  %s363_s27, 32, %s620_s7, [#allocation4]  }
 0x2f8   :  { %492 = dma.done.wait [#allocation4], 32  }
 0x2f9   :  { %493 = vsyncadd [#allocation4], 4294967264 }
 0x2fa   :  { %369 = vsyncpa [#allocation3], 1 }
 0x2fb   :  { %370 = vsyncpa [#allocation4], 1 }

</bundles_post_ra>
